<compile_context>
chip_gen: v5e
topology: v5e:2x2
jax: 0.10.0
libtpu: 0.0.40
codegen_flags: <defaults>
</compile_context>

<pallas_src>
import jax
import jax.numpy as jnp
from jax.experimental import pallas as pl
from jax.experimental.pallas import tpu as pltpu

# ---- static configuration (small, consistent with the module's forward) ----
N, C, H, W = 2, 4, 16, 16     # input: [2, 4, 16, 16] NCHW
K_BLOCKS = 3                  # number of invertible coupling blocks
C1 = C // 2                   # channel split
HID = 32                      # hidden width of the coupling MLP


def invertible_kernel(x_ref, w1_ref, b1_ref, w2_ref, b2_ref, o_ref):
    # x_ref / o_ref: (1, C, H*W) tile -- channels on sublanes, spatial on lanes.
    # w1_ref: (K, C1, HID, 1)  column-vector layout for lane broadcast
    # b1_ref: (K, HID, 1)
    # w2_ref: (K, C1, HID)     pre-transposed second-layer weights
    # b2_ref: (K, C1, 1)
    x = x_ref[0].astype(jnp.float32) / 10.0           # u / 10, (C, HW)
    w1 = w1_ref[...].astype(jnp.float32)
    b1 = b1_ref[...].astype(jnp.float32)
    w2 = w2_ref[...].astype(jnp.float32)
    b2 = b2_ref[...].astype(jnp.float32)

    x1 = x[:C1, :]                                     # (C1, HW)
    x2 = x[C1:, :]                                     # (C1, HW)

    # K_BLOCKS is tiny and static -> fully unrolled Python loop.
    for k in range(K_BLOCKS):
        # First layer (contraction depth C1=2): VPU broadcast-FMAs, no MXU.
        h = b1[k]                                      # (HID, 1) -> broadcast
        for c in range(C1):
            h = h + w1[k, c] * x1[c:c + 1, :]          # (HID,1)*(1,HW) -> (HID,HW)
        h = jnp.maximum(h, 0.0)                        # ReLU

        # Second layer: keep the HID=32 contraction as a single small dot.
        dx2 = jnp.dot(w2[k], h, preferred_element_type=jnp.float32) + b2[k]
        x2 = x2 + dx2
        x1, x2 = x2, x1                                # swap halves (invertible)

    # Direct slice stores, *10 folded in; no concatenate.
    o_ref[0, :C1, :] = (x1 * 10.0).astype(o_ref.dtype)
    o_ref[0, C1:, :] = (x2 * 10.0).astype(o_ref.dtype)


def invertible_forward(x_nchw, w1, b1, w2, b2):
    n, c, h, w = x_nchw.shape
    hw = h * w
    assert c == C and hw % 128 == 0

    # NCHW is already channel-major: this reshape is free (no data movement).
    x_rows = x_nchw.reshape(n, c, hw)

    # Tiny parameter re-layouts (done once, outside the kernel) so the kernel
    # needs no in-kernel transposes / relayouts.
    w1r = w1[..., None]                  # (K, C1, HID, 1)
    b1r = b1[..., None]                  # (K, HID, 1)
    w2t = jnp.swapaxes(w2, 1, 2)         # (K, C1, HID)
    b2r = b2[..., None]                  # (K, C1, 1)

    out = pl.pallas_call(
        invertible_kernel,
        out_shape=jax.ShapeDtypeStruct((n, c, hw), x_nchw.dtype),
        grid=(n,),
        in_specs=[
            pl.BlockSpec((1, c, hw), lambda i: (i, 0, 0)),
            pl.BlockSpec(w1r.shape, lambda i: (0, 0, 0, 0)),  # resident across steps
            pl.BlockSpec(b1r.shape, lambda i: (0, 0, 0)),
            pl.BlockSpec(w2t.shape, lambda i: (0, 0, 0)),
            pl.BlockSpec(b2r.shape, lambda i: (0, 0, 0)),
        ],
        out_specs=pl.BlockSpec((1, c, hw), lambda i: (i, 0, 0)),
        compiler_params=pltpu.CompilerParams(dimension_semantics=("parallel",)),
    )(x_rows, w1r, b1r, w2t, b2r)

    return out.reshape(n, c, h, w)


def reference_forward(x_nchw, w1, b1, w2, b2):
    """Pure-JAX reference matching the PyTorch module semantics."""
    n, c, h, w = x_nchw.shape
    x = jnp.transpose(x_nchw, (0, 2, 3, 1)).reshape(-1, c).astype(jnp.float32) / 10.0
    x1, x2 = x[:, :C1], x[:, C1:]
    for k in range(K_BLOCKS):
        hid = jnp.maximum(x1 @ w1[k] + b1[k], 0.0)
        x2 = x2 + hid @ w2[k] + b2[k]
        x1, x2 = x2, x1
    out = jnp.concatenate([x1, x2], axis=-1) * 10.0
    return out.reshape(n, h, w, c).transpose(0, 3, 1, 2)


if __name__ == "__main__":
    key = jax.random.PRNGKey(0)
    kx, k1, k2, k3, k4 = jax.random.split(key, 5)

    # Deterministic parameter init (synthetic; the module's blocks are supplied
    # externally, so we define standard additive-coupling MLP blocks).
    # TODO(synk): the PyTorch `blocks` are not defined in the module; additive
    # coupling blocks are assumed here.
    w1 = 0.1 * jax.random.normal(k1, (K_BLOCKS, C1, HID), dtype=jnp.float32)
    b1 = 0.1 * jax.random.normal(k2, (K_BLOCKS, HID), dtype=jnp.float32)
    w2 = 0.1 * jax.random.normal(k3, (K_BLOCKS, HID, C1), dtype=jnp.float32)
    b2 = 0.1 * jax.random.normal(k4, (K_BLOCKS, C1), dtype=jnp.float32)

    x = jax.random.normal(kx, (N, C, H, W), dtype=jnp.float32)

    out = jax.block_until_ready(invertible_forward(x, w1, b1, w2, b2))
    ref = reference_forward(x, w1, b1, w2, b2)

    assert out.shape == (N, C, H, W)
    assert jnp.allclose(out, ref, atol=1e-5, rtol=1e-5), "mismatch vs reference"

    print("KERNEL_OK")
</pallas_src>

<mosaic_0001>
module attributes {stable_mosaic.version = 11 : i64} {
  func.func @invertible_kernel(%arg0: i32, %arg1: memref<1x4x256xf32, #tpu.memory_space<vmem>>, %arg2: memref<3x2x32x1xf32, #tpu.memory_space<vmem>>, %arg3: memref<3x32x1xf32, #tpu.memory_space<vmem>>, %arg4: memref<3x2x32xf32, #tpu.memory_space<vmem>>, %arg5: memref<3x2x1xf32, #tpu.memory_space<vmem>>, %arg6: memref<1x4x256xf32, #tpu.memory_space<vmem>>) attributes {dimension_semantics = [#tpu.dimension_semantics<parallel>], iteration_bounds = array<i64: 2>, scalar_prefetch = 0 : i64, scratch_operands = 0 : i64, tpu.core_type = #tpu.core_type<tc>, window_params = [{transform_indices = @transform_0, window_bounds = array<i64: 1, 4, 256>}, {pipeline_mode = #tpu.pipeline_mode<synchronous>, transform_indices = @transform_1, window_bounds = array<i64: 3, 2, 32, 1>}, {pipeline_mode = #tpu.pipeline_mode<synchronous>, transform_indices = @transform_2, window_bounds = array<i64: 3, 32, 1>}, {pipeline_mode = #tpu.pipeline_mode<synchronous>, transform_indices = @transform_3, window_bounds = array<i64: 3, 2, 32>}, {pipeline_mode = #tpu.pipeline_mode<synchronous>, transform_indices = @transform_4, window_bounds = array<i64: 3, 2, 1>}, {transform_indices = @transform_5, window_bounds = array<i64: 1, 4, 256>}]} {
    %c0 = arith.constant 0 : index
    %c0_0 = arith.constant 0 : index
    %c0_1 = arith.constant 0 : index
    %0 = vector.load %arg1[%c0, %c0_0, %c0_1] : memref<1x4x256xf32, #tpu.memory_space<vmem>>, vector<1x4x256xf32>
    %1 = vector.shape_cast %0 : vector<1x4x256xf32> to vector<4x256xf32>
    %cst = arith.constant 1.000000e+01 : f32
    %2 = vector.broadcast %cst : f32 to vector<4x256xf32>
    %3 = arith.divf %1, %2 : vector<4x256xf32>
    %c0_2 = arith.constant 0 : index
    %c0_3 = arith.constant 0 : index
    %c0_4 = arith.constant 0 : index
    %c0_5 = arith.constant 0 : index
    %4 = vector.load %arg2[%c0_2, %c0_3, %c0_4, %c0_5] : memref<3x2x32x1xf32, #tpu.memory_space<vmem>>, vector<3x2x32x1xf32>
    %c0_6 = arith.constant 0 : index
    %c0_7 = arith.constant 0 : index
    %c0_8 = arith.constant 0 : index
    %5 = vector.load %arg3[%c0_6, %c0_7, %c0_8] : memref<3x32x1xf32, #tpu.memory_space<vmem>>, vector<3x32x1xf32>
    %c0_9 = arith.constant 0 : index
    %c0_10 = arith.constant 0 : index
    %c0_11 = arith.constant 0 : index
    %6 = vector.load %arg4[%c0_9, %c0_10, %c0_11] : memref<3x2x32xf32, #tpu.memory_space<vmem>>, vector<3x2x32xf32>
    %c0_12 = arith.constant 0 : index
    %c0_13 = arith.constant 0 : index
    %c0_14 = arith.constant 0 : index
    %7 = vector.load %arg5[%c0_12, %c0_13, %c0_14] : memref<3x2x1xf32, #tpu.memory_space<vmem>>, vector<3x2x1xf32>
    %8 = vector.extract_strided_slice %3 {offsets = [0, 0], sizes = [2, 256], strides = [1, 1]} : vector<4x256xf32> to vector<2x256xf32>
    %9 = vector.extract_strided_slice %3 {offsets = [2, 0], sizes = [2, 256], strides = [1, 1]} : vector<4x256xf32> to vector<2x256xf32>
    %10 = vector.extract_strided_slice %5 {offsets = [0, 0, 0], sizes = [1, 32, 1], strides = [1, 1, 1]} : vector<3x32x1xf32> to vector<1x32x1xf32>
    %11 = vector.shape_cast %10 : vector<1x32x1xf32> to vector<32x1xf32>
    %12 = vector.extract_strided_slice %4 {offsets = [0, 0, 0, 0], sizes = [1, 1, 32, 1], strides = [1, 1, 1, 1]} : vector<3x2x32x1xf32> to vector<1x1x32x1xf32>
    %13 = vector.shape_cast %12 : vector<1x1x32x1xf32> to vector<32x1xf32>
    %14 = vector.extract_strided_slice %8 {offsets = [0, 0], sizes = [1, 256], strides = [1, 1]} : vector<2x256xf32> to vector<1x256xf32>
    %15 = vector.broadcast %13 : vector<32x1xf32> to vector<32x256xf32>
    %16 = vector.broadcast %14 : vector<1x256xf32> to vector<32x256xf32>
    %17 = arith.mulf %15, %16 : vector<32x256xf32>
    %18 = vector.broadcast %11 : vector<32x1xf32> to vector<32x256xf32>
    %19 = arith.addf %18, %17 : vector<32x256xf32>
    %20 = vector.extract_strided_slice %4 {offsets = [0, 1, 0, 0], sizes = [1, 1, 32, 1], strides = [1, 1, 1, 1]} : vector<3x2x32x1xf32> to vector<1x1x32x1xf32>
    %21 = vector.shape_cast %20 : vector<1x1x32x1xf32> to vector<32x1xf32>
    %22 = vector.extract_strided_slice %8 {offsets = [1, 0], sizes = [1, 256], strides = [1, 1]} : vector<2x256xf32> to vector<1x256xf32>
    %23 = vector.broadcast %21 : vector<32x1xf32> to vector<32x256xf32>
    %24 = vector.broadcast %22 : vector<1x256xf32> to vector<32x256xf32>
    %25 = arith.mulf %23, %24 : vector<32x256xf32>
    %26 = arith.addf %19, %25 : vector<32x256xf32>
    %cst_15 = arith.constant 0.000000e+00 : f32
    %27 = vector.broadcast %cst_15 : f32 to vector<32x256xf32>
    %28 = arith.maximumf %26, %27 : vector<32x256xf32>
    %29 = vector.extract_strided_slice %6 {offsets = [0, 0, 0], sizes = [1, 2, 32], strides = [1, 1, 1]} : vector<3x2x32xf32> to vector<1x2x32xf32>
    %30 = vector.shape_cast %29 : vector<1x2x32xf32> to vector<2x32xf32>
    %cst_16 = arith.constant dense<0.000000e+00> : vector<2x256xf32>
    %31 = tpu.matmul %30, %28, %cst_16 {dimension_numbers = #tpu.dot_dimension_numbers<[1], [0], [0], [1], [0, 0, 1, 1], [], []>} : vector<2x32xf32>, vector<32x256xf32>, vector<2x256xf32> -> vector<2x256xf32>
    %32 = vector.extract_strided_slice %7 {offsets = [0, 0, 0], sizes = [1, 2, 1], strides = [1, 1, 1]} : vector<3x2x1xf32> to vector<1x2x1xf32>
    %33 = vector.shape_cast %32 : vector<1x2x1xf32> to vector<2x1xf32>
    %34 = vector.broadcast %33 : vector<2x1xf32> to vector<2x256xf32>
    %35 = arith.addf %31, %34 : vector<2x256xf32>
    %36 = arith.addf %9, %35 : vector<2x256xf32>
    %37 = vector.extract_strided_slice %5 {offsets = [1, 0, 0], sizes = [1, 32, 1], strides = [1, 1, 1]} : vector<3x32x1xf32> to vector<1x32x1xf32>
    %38 = vector.shape_cast %37 : vector<1x32x1xf32> to vector<32x1xf32>
    %39 = vector.extract_strided_slice %4 {offsets = [1, 0, 0, 0], sizes = [1, 1, 32, 1], strides = [1, 1, 1, 1]} : vector<3x2x32x1xf32> to vector<1x1x32x1xf32>
    %40 = vector.shape_cast %39 : vector<1x1x32x1xf32> to vector<32x1xf32>
    %41 = vector.extract_strided_slice %36 {offsets = [0, 0], sizes = [1, 256], strides = [1, 1]} : vector<2x256xf32> to vector<1x256xf32>
    %42 = vector.broadcast %40 : vector<32x1xf32> to vector<32x256xf32>
    %43 = vector.broadcast %41 : vector<1x256xf32> to vector<32x256xf32>
    %44 = arith.mulf %42, %43 : vector<32x256xf32>
    %45 = vector.broadcast %38 : vector<32x1xf32> to vector<32x256xf32>
    %46 = arith.addf %45, %44 : vector<32x256xf32>
    %47 = vector.extract_strided_slice %4 {offsets = [1, 1, 0, 0], sizes = [1, 1, 32, 1], strides = [1, 1, 1, 1]} : vector<3x2x32x1xf32> to vector<1x1x32x1xf32>
    %48 = vector.shape_cast %47 : vector<1x1x32x1xf32> to vector<32x1xf32>
    %49 = vector.extract_strided_slice %36 {offsets = [1, 0], sizes = [1, 256], strides = [1, 1]} : vector<2x256xf32> to vector<1x256xf32>
    %50 = vector.broadcast %48 : vector<32x1xf32> to vector<32x256xf32>
    %51 = vector.broadcast %49 : vector<1x256xf32> to vector<32x256xf32>
    %52 = arith.mulf %50, %51 : vector<32x256xf32>
    %53 = arith.addf %46, %52 : vector<32x256xf32>
    %cst_17 = arith.constant 0.000000e+00 : f32
    %54 = vector.broadcast %cst_17 : f32 to vector<32x256xf32>
    %55 = arith.maximumf %53, %54 : vector<32x256xf32>
    %56 = vector.extract_strided_slice %6 {offsets = [1, 0, 0], sizes = [1, 2, 32], strides = [1, 1, 1]} : vector<3x2x32xf32> to vector<1x2x32xf32>
    %57 = vector.shape_cast %56 : vector<1x2x32xf32> to vector<2x32xf32>
    %cst_18 = arith.constant dense<0.000000e+00> : vector<2x256xf32>
    %58 = tpu.matmul %57, %55, %cst_18 {dimension_numbers = #tpu.dot_dimension_numbers<[1], [0], [0], [1], [0, 0, 1, 1], [], []>} : vector<2x32xf32>, vector<32x256xf32>, vector<2x256xf32> -> vector<2x256xf32>
    %59 = vector.extract_strided_slice %7 {offsets = [1, 0, 0], sizes = [1, 2, 1], strides = [1, 1, 1]} : vector<3x2x1xf32> to vector<1x2x1xf32>
    %60 = vector.shape_cast %59 : vector<1x2x1xf32> to vector<2x1xf32>
    %61 = vector.broadcast %60 : vector<2x1xf32> to vector<2x256xf32>
    %62 = arith.addf %58, %61 : vector<2x256xf32>
    %63 = arith.addf %8, %62 : vector<2x256xf32>
    %64 = vector.extract_strided_slice %5 {offsets = [2, 0, 0], sizes = [1, 32, 1], strides = [1, 1, 1]} : vector<3x32x1xf32> to vector<1x32x1xf32>
    %65 = vector.shape_cast %64 : vector<1x32x1xf32> to vector<32x1xf32>
    %66 = vector.extract_strided_slice %4 {offsets = [2, 0, 0, 0], sizes = [1, 1, 32, 1], strides = [1, 1, 1, 1]} : vector<3x2x32x1xf32> to vector<1x1x32x1xf32>
    %67 = vector.shape_cast %66 : vector<1x1x32x1xf32> to vector<32x1xf32>
    %68 = vector.extract_strided_slice %63 {offsets = [0, 0], sizes = [1, 256], strides = [1, 1]} : vector<2x256xf32> to vector<1x256xf32>
    %69 = vector.broadcast %67 : vector<32x1xf32> to vector<32x256xf32>
    %70 = vector.broadcast %68 : vector<1x256xf32> to vector<32x256xf32>
    %71 = arith.mulf %69, %70 : vector<32x256xf32>
    %72 = vector.broadcast %65 : vector<32x1xf32> to vector<32x256xf32>
    %73 = arith.addf %72, %71 : vector<32x256xf32>
    %74 = vector.extract_strided_slice %4 {offsets = [2, 1, 0, 0], sizes = [1, 1, 32, 1], strides = [1, 1, 1, 1]} : vector<3x2x32x1xf32> to vector<1x1x32x1xf32>
    %75 = vector.shape_cast %74 : vector<1x1x32x1xf32> to vector<32x1xf32>
    %76 = vector.extract_strided_slice %63 {offsets = [1, 0], sizes = [1, 256], strides = [1, 1]} : vector<2x256xf32> to vector<1x256xf32>
    %77 = vector.broadcast %75 : vector<32x1xf32> to vector<32x256xf32>
    %78 = vector.broadcast %76 : vector<1x256xf32> to vector<32x256xf32>
    %79 = arith.mulf %77, %78 : vector<32x256xf32>
    %80 = arith.addf %73, %79 : vector<32x256xf32>
    %cst_19 = arith.constant 0.000000e+00 : f32
    %81 = vector.broadcast %cst_19 : f32 to vector<32x256xf32>
    %82 = arith.maximumf %80, %81 : vector<32x256xf32>
    %83 = vector.extract_strided_slice %6 {offsets = [2, 0, 0], sizes = [1, 2, 32], strides = [1, 1, 1]} : vector<3x2x32xf32> to vector<1x2x32xf32>
    %84 = vector.shape_cast %83 : vector<1x2x32xf32> to vector<2x32xf32>
    %cst_20 = arith.constant dense<0.000000e+00> : vector<2x256xf32>
    %85 = tpu.matmul %84, %82, %cst_20 {dimension_numbers = #tpu.dot_dimension_numbers<[1], [0], [0], [1], [0, 0, 1, 1], [], []>} : vector<2x32xf32>, vector<32x256xf32>, vector<2x256xf32> -> vector<2x256xf32>
    %86 = vector.extract_strided_slice %7 {offsets = [2, 0, 0], sizes = [1, 2, 1], strides = [1, 1, 1]} : vector<3x2x1xf32> to vector<1x2x1xf32>
    %87 = vector.shape_cast %86 : vector<1x2x1xf32> to vector<2x1xf32>
    %88 = vector.broadcast %87 : vector<2x1xf32> to vector<2x256xf32>
    %89 = arith.addf %85, %88 : vector<2x256xf32>
    %90 = arith.addf %36, %89 : vector<2x256xf32>
    %cst_21 = arith.constant 1.000000e+01 : f32
    %91 = vector.broadcast %cst_21 : f32 to vector<2x256xf32>
    %92 = arith.mulf %90, %91 : vector<2x256xf32>
    %c0_22 = arith.constant 0 : index
    %c0_23 = arith.constant 0 : index
    %c0_24 = arith.constant 0 : index
    %93 = vector.load %arg6[%c0_22, %c0_23, %c0_24] : memref<1x4x256xf32, #tpu.memory_space<vmem>>, vector<1x2x256xf32>
    %94 = vector.shape_cast %93 : vector<1x2x256xf32> to vector<2x256xf32>
    %95 = vector.shape_cast %92 : vector<2x256xf32> to vector<1x2x256xf32>
    tpu.vector_store %arg6[%c0_22, %c0_23, %c0_24], %95 {strides = array<i32>} : memref<1x4x256xf32, #tpu.memory_space<vmem>>, vector<1x2x256xf32>,
    %cst_25 = arith.constant 1.000000e+01 : f32
    %96 = vector.broadcast %cst_25 : f32 to vector<2x256xf32>
    %97 = arith.mulf %63, %96 : vector<2x256xf32>
    %c0_26 = arith.constant 0 : index
    %c2 = arith.constant 2 : index
    %c0_27 = arith.constant 0 : index
    %98 = vector.load %arg6[%c0_26, %c2, %c0_27] : memref<1x4x256xf32, #tpu.memory_space<vmem>>, vector<1x2x256xf32>
    %99 = vector.shape_cast %98 : vector<1x2x256xf32> to vector<2x256xf32>
    %100 = vector.shape_cast %97 : vector<2x256xf32> to vector<1x2x256xf32>
    tpu.vector_store %arg6[%c0_26, %c2, %c0_27], %100 {strides = array<i32>} : memref<1x4x256xf32, #tpu.memory_space<vmem>>, vector<1x2x256xf32>,
    return
  }
  func.func @transform_0(%arg0: i32) -> (i32, i32, i32) {
    %c0_i32 = arith.constant 0 : i32
    %c0_i32_0 = arith.constant 0 : i32
    %c0_i32_1 = arith.constant 0 : i32
    return %arg0, %c0_i32, %c0_i32_0 : i32, i32, i32
  }
  func.func @transform_1(%arg0: i32) -> (i32, i32, i32, i32) {
    %c0_i32 = arith.constant 0 : i32
    %c0_i32_0 = arith.constant 0 : i32
    %c0_i32_1 = arith.constant 0 : i32
    %c0_i32_2 = arith.constant 0 : i32
    %c0_i32_3 = arith.constant 0 : i32
    return %c0_i32, %c0_i32_0, %c0_i32_1, %c0_i32_2 : i32, i32, i32, i32
  }
  func.func @transform_2(%arg0: i32) -> (i32, i32, i32) {
    %c0_i32 = arith.constant 0 : i32
    %c0_i32_0 = arith.constant 0 : i32
    %c0_i32_1 = arith.constant 0 : i32
    %c0_i32_2 = arith.constant 0 : i32
    return %c0_i32, %c0_i32_0, %c0_i32_1 : i32, i32, i32
  }
  func.func @transform_3(%arg0: i32) -> (i32, i32, i32) {
    %c0_i32 = arith.constant 0 : i32
    %c0_i32_0 = arith.constant 0 : i32
    %c0_i32_1 = arith.constant 0 : i32
    %c0_i32_2 = arith.constant 0 : i32
    return %c0_i32, %c0_i32_0, %c0_i32_1 : i32, i32, i32
  }
  func.func @transform_4(%arg0: i32) -> (i32, i32, i32) {
    %c0_i32 = arith.constant 0 : i32
    %c0_i32_0 = arith.constant 0 : i32
    %c0_i32_1 = arith.constant 0 : i32
    %c0_i32_2 = arith.constant 0 : i32
    return %c0_i32, %c0_i32_0, %c0_i32_1 : i32, i32, i32
  }
  func.func @transform_5(%arg0: i32) -> (i32, i32, i32) {
    %c0_i32 = arith.constant 0 : i32
    %c0_i32_0 = arith.constant 0 : i32
    %c0_i32_1 = arith.constant 0 : i32
    return %arg0, %c0_i32, %c0_i32_0 : i32, i32, i32
  }
}

</mosaic_0001>

<bundles_post_ra>
// kernel: tpu_custom_call.1
= control target key start
LH: loop header
LB: loop body
LE: loop exit
PB: predicated region body
PF: predicated region fallthrough
CT: control target
= control target key end

     0   :  { %10 = vsyncpa [#allocation3], 0  ;;  %s1273_s0 = inlined_call_operand.vmem [shape: f32[2,4,256], index: 0, kind: input, shape index: {}]   ;;  %s1274_s1 = inlined_call_operand.vmem [shape: f32[3,2,32,1], index: 1, kind: input, shape index: {}]   ;;  %s1275_s2 = inlined_call_operand.vmem [shape: f32[3,32,1], index: 2, kind: input, shape index: {}]   ;;  %s1276_s3 = inlined_call_operand.vmem [shape: f32[3,2,32], index: 3, kind: input, shape index: {}]   ;;  %s1277_s4 = inlined_call_operand.vmem [shape: f32[3,2,1], index: 4, kind: input, shape index: {}]   ;;  %s1278_s5 = inlined_call_operand.hbm [shape: f32[2,4,256], index: 5, kind: output, shape index: {}]  }
   0x1   :  { %12 = vsyncpa [#allocation3 + $0x1], 0  ;;  %s1029_s18 = smov 0   ;;  %s1031_s19 = smov 0  }
   0x2   :  { %s1033_s20 = smov 0   ;;  %s1035_s21 = smov 0  }
   0x3 LB: > { %s1050_s22 = sadd.s32 4294967295, %s995_s21   ;;  %s866_s23 = sadd.s32 4294967294, %s995_s21   ;;  %s995_s21 = sphi %s1035_s21, %s1284_s21   ;;  %s991_s20 = sphi %s1033_s20, %s1283_s20   ;;  %s987_s19 = sphi %s1031_s19, %s1282_s19   ;;  %s983_s18 = sphi %s1029_s18, %s1281_s18  }
   0x4   : > { %s1054_s24 = sadd.s32 1, %s995_s21   ;;  %s135_s25 = sadd.s32 1, %s991_s20 }
   0x5   : > { %s132_s26 = ssub.s32 %s995_s21, %s1054_s24  ;;  %p145_p0 = scmp.ne.s32.totalorder %s991_s20, %s987_s19 }
   0x6   : > { %p133_p1 = scmp.eq.s32.totalorder %s132_s26, 0  ;;  %p146_p2 = scmp.eq.s32.totalorder %s1050_s22, 1 }
   0x7   : > { %p151_p3 = scmp.ne.s32.totalorder %s987_s19, %s983_s18  ;;  %p152_p4 = scmp.eq.s32.totalorder %s866_s23, 1 }
   0x8   : > { %s1065_s27 = scalar_select %p133_p1, %s991_s20, %s135_s25  }
   0x9   : > { %p1067_p5 = por %p146_p2, %p145_p0  ;;  %p1071_p6 = por %p152_p4, %p151_p3 }
   0xa   : > { %p869_p7 = scmp.ge.s32.totalorder %s995_s21, 1  ;;  %p190_p8 = scmp.lt.s32.totalorder %s995_s21, 3 }
   0xc   : > { %p191_p9 = pnand %p869_p7, %p190_p8 }
   0xd   : > { %p218_p10 = scmp.lt.s32.totalorder (!%p191_p9), %s1050_s22, 1  ;;  %s215_s12 = sand.u32 (!%p191_p9), 1, %s987_s19  }
   0xe   : > { %194 = sbr.rel (%p191_p9) target bundleno = 626 (0x272), region = 40  ;;  %s870_s13 = sshll.u32 (!%p191_p9), %s215_s12, 3 }
   0xf   : > { %s1228_s14 = scalar_lea.vmem (!%p191_p9), [#allocation2], %s870_s13  ;;  %s886_s17 = sshll.u32 (!%p191_p9), %s1050_s22, 3 }
  0x10   : > { %s804_s30 = sshll.u32 (!%p191_p9), %s1228_s14, 4  ;;  %s953_s11 = scalar_lea.hbm (!%p191_p9), %s1278_s5, 16  ;;  %s805_s30 = int_to_ptr.vmem [resolvable:$true] %s804_s30 }
  0x13   : > { %v259_v0 = vld [vmem:[%s1275_s2 + $0x18] sm:$0xff]  ;;  %v233_v2 = vld [vmem:[%s1274_s1 + $0x8] sm:$0xff]  ;;  %v997_v3 = vmov 0   ;;  %v234_v5 = vld [vmem:[%s1274_s1 + $0x10] sm:$0xff]  ;;  %v998_v34 = vmov 10.0   ;;  %s219_s15 = scalar_select %p218_p10, %s1050_s22, 1 }
  0x14   : > { %v235_v1 = vld [vmem:[%s1274_s1 + $0x18] sm:$0xff]  ;;  %930 = vset.pattern.permute.xlu2 %v997_v3  ;;  %929 = vset.pattern.permute.xlu1 %v997_v3  ;;  %v258_v6 = vld [vmem:[%s1275_s2 + $0x10] sm:$0xff]  ;;  %v232_v7 = vld [vmem:[%s1274_s1] sm:$0xff]  ;;  %931 = vrcp.f32 %v998_v34  ;;  %vm392_vm1 = vcmask 261120   ;;  %vm439_vm2 = vcmask 1043456  }
  0x15   : > { %928 = vset.pattern.permute.xlu0 %v997_v3  ;;  %326 = vperm.xlu1 %929, %v259_v0   ;;  %v239_v4 = vld [vmem:[%s1274_s1 + $0x38] sm:$0xff]  ;;  %v238_v8 = vld [vmem:[%s1274_s1 + $0x30] sm:$0xff]  ;;  %v257_v9 = vld [vmem:[%s1275_s2 + $0x8] sm:$0xff]  ;;  %s885_s26 = sshll.u32 %s219_s15, 3 }
  0x16   : > { %291 = vperm.xlu0 %928, %v235_v1   ;;  %281 = vperm.xlu2 %930, %v233_v2   ;;  %v256_v10 = vld [vmem:[%s1275_s2] sm:$0xff]  ;;  %v237_v11 = vld [vmem:[%s1274_s1 + $0x28] sm:$0xff]  ;;  %v243_v13 = vld [vmem:[%s1274_s1 + $0x58] sm:$0xff]  ;;  %s222_s7 = scalar_lea.vmem %s1273_s0, %s885_s26  ;;  %s802_s26 = scalar_lea.hbm %s1278_s5, %s886_s17 }
  0x17   : > { %v236_v12 = vld [vmem:[%s1274_s1 + $0x20] sm:$0xff]  ;;  %v242_v15 = vld [vmem:[%s1274_s1 + $0x50] sm:$0xff]  ;;  %v247_v16 = vld [vmem:[%s1274_s1 + $0x78] sm:$0xff]  ;;  %s806_s6 = sshll.u32 %s802_s26, 4  ;;  %s807_s6 = int_to_ptr.hbm [resolvable:$true] %s806_s6 }
  0x18   : > { %v271_v14 = vld [vmem:[%s1277_s4] sm:$0x3]  ;;  %v263_v17 = vld [vmem:[%s1275_s2 + $0x38] sm:$0xff]  ;;  %v241_v18 = vld [vmem:[%s1274_s1 + $0x48] sm:$0xff]  ;;  %s947_s22 = sshra.s32 %s807_s6, 4  ;;  %s948_s22 = int_to_ptr.hbm [resolvable:$true] %s947_s22 }
  0x19   : > { %v246_v19 = vld [vmem:[%s1274_s1 + $0x70] sm:$0xff]  ;;  %v240_v21 = vld [vmem:[%s1274_s1 + $0x40] sm:$0xff]  ;;  %v245_v22 = vld [vmem:[%s1274_s1 + $0x68] sm:$0xff]  ;;  %s949_s8 = scalar_lea.hbm %s948_s22, 8  ;;  %p954_p0 = scmp.lt.s32.totalorder %s948_s22, %s1278_s5 }
  0x1a   : > { %v262_v20 = vld [vmem:[%s1275_s2 + $0x30] sm:$0xff]  ;;  %v261_v23 = vld [vmem:[%s1275_s2 + $0x28] sm:$0xff]  ;;  %v260_v24 = vld [vmem:[%s1275_s2 + $0x20] sm:$0xff]  ;;  %v932_v35 = vpop.eup %931  ;;  %p950_p11 = scmp.ne.s32.totalorder %s948_s22, %s949_s8  ;;  %p955_p1 = scmp.lt.s32.totalorder %s953_s11, %s949_s8 }
  0x1b   : > { %v272_v25 = vld [vmem:[%s1277_s4 + $0x2] sm:$0x3]  ;;  %v251_v27 = vld [vmem:[%s1274_s1 + $0x98] sm:$0xff]  ;;  %v250_v29 = vld [vmem:[%s1274_s1 + $0x90] sm:$0xff]  ;;  %v225_v39 = vmul.f32 10.0, %v932_v35  ;;  %vm229_vm0 = vweird.f32 %v932_v35 }
  0x1c   : > { %v244_v26 = vld [vmem:[%s1274_s1 + $0x60] sm:$0xff]  ;;  %v267_v28 = vld [vmem:[%s1275_s2 + $0x58] sm:$0xff]  ;;  %v266_v31 = vld [vmem:[%s1275_s2 + $0x50] sm:$0xff]  ;;  %p951_p12 = pnand %p950_p11, %p1067_p5  ;;  %p956_p2 = por %p955_p1, %p954_p0 }
  0x1d   : > { %354 = vperm.xlu1 %929, %v239_v4   ;;  %v255_v30 = vld [vmem:[%s1274_s1 + $0xb8] sm:$0xff]  ;;  %v249_v32 = vld [vmem:[%s1274_s1 + $0x88] sm:$0xff]  ;;  %v254_v33 = vld [vmem:[%s1274_s1 + $0xb0] sm:$0xff]  ;;  %v226_v40 = vsub.f32 1.0, %v225_v39 }
  0x1e   : > { %286 = vperm.xlu0 %928, %v234_v5   ;;  %321 = vperm.xlu2 %930, %v258_v6   ;;  %v265_v36 = vld [vmem:[%s1275_s2 + $0x48] sm:$0xff]  ;;  %v248_v37 = vld [vmem:[%s1274_s1 + $0x80] sm:$0xff]  ;;  %p952_p13 = pneg %p951_p12 }
  0x1f   : > { %v253_v38 = vld [vmem:[%s1274_s1 + $0xa8] sm:$0xff]  ;;  %v252_v41 = vld [vmem:[%s1274_s1 + $0xa0] sm:$0xff]  ;;  %v227_v44 = vmul.f32 %v932_v35, %v226_v40 }
  0x20   : > { %v264_v42 = vld [vmem:[%s1275_s2 + $0x40] sm:$0xff]  ;;  %p957_p3 = pnand %p956_p2, %p952_p13 }
  0x21   : > { %v273_v43 = vld [vmem:[%s1277_s4 + $0x4] sm:$0x3]  ;;  %v228_v45 = vadd.f32 %v932_v35, %v227_v44 }
  0x22   : > { %v223_v46 = vld [vmem:[%s222_s7] sm:$0xff]  ;;  %s791_s7 = scalar_lea.sflag [#allocation3], %s215_s12 }
  0x23   : > { %v230_v47 = vsel %vm229_vm0, %v932_v35, %v228_v45  ;;  %v268_v45 = vld [vmem:[%s1276_s3] sm:$0x3] }
  0x24   : > { %v1199_v48 = vmul.f32 %v230_v47, %v223_v46 }
  0x25   : > { %276 = vperm.xlu1 %929, %v232_v7  }
  0x26   : > { %349 = vperm.xlu0 %928, %v238_v8   ;;  %316 = vperm.xlu2 %930, %v257_v9   ;;  %v295_v50 = vperm.slane %v1199_v48, 0  ;;  %v296_v51 = vperm.slane %v1199_v48, 4  ;;  %v357_v56 = vperm.slane %v1199_v48, 1  ;;  %v358_v57 = vperm.slane %v1199_v48, 5 }
  0x28   : > { %v299_v53 = vperm.slane %v295_v50, 0  ;;  %v300_v54 = vperm.slane %v296_v51, 0  ;;  %v361_v61 = vperm.slane %v357_v56, 1  ;;  %v362_v62 = vperm.slane %v358_v57, 1 }
  0x2d   : > { %311 = vperm.xlu1 %929, %v256_v10  }
  0x2e   : > { %344 = vperm.xlu0 %928, %v237_v11   ;;  %339 = vperm.xlu2 %930, %v236_v12  }
  0x35   : > { %461 = vperm.xlu1 %929, %v243_v13  }
  0x36   : > { %389 = vperm.xlu0 %928, %v271_v14   ;;  %456 = vperm.xlu2 %930, %v242_v15  }
  0x3d   : > { %524 = vperm.xlu1 %929, %v247_v16  }
  0x3e   : > { %496 = vperm.xlu0 %928, %v263_v17   ;;  %451 = vperm.xlu2 %930, %v241_v18  }
  0x45   : > { %519 = vperm.xlu1 %929, %v246_v19  }
  0x46   : > { %491 = vperm.xlu0 %928, %v262_v20   ;;  %446 = vperm.xlu2 %930, %v240_v21  }
  0x4d   : > { %514 = vperm.xlu1 %929, %v245_v22  }
  0x4e   : > { %486 = vperm.xlu0 %928, %v261_v23   ;;  %481 = vperm.xlu2 %930, %v260_v24  }
  0x55   : > { %559 = vperm.xlu1 %929, %v272_v25  }
  0x56   : > { %509 = vperm.xlu0 %928, %v244_v26   ;;  %628 = vperm.xlu2 %930, %v251_v27  }
  0x5d   : > { %663 = vperm.xlu1 %929, %v267_v28  }
  0x5e   : > { %623 = vperm.xlu0 %928, %v250_v29   ;;  %691 = vperm.xlu2 %930, %v255_v30  }
  0x65   : > { %658 = vperm.xlu1 %929, %v266_v31  }
  0x66   : > { %618 = vperm.xlu0 %928, %v249_v32   ;;  %686 = vperm.xlu2 %930, %v254_v33  }
  0x6d   : > { %653 = vperm.xlu1 %929, %v265_v36  }
  0x6e   : > { %613 = vperm.xlu0 %928, %v248_v37   ;;  %681 = vperm.xlu2 %930, %v253_v38  }
  0x70   : > { %v282_v49 = vpop.permute.xlu2 %281 }
  0x71   : > { %v303_v20 = vmul.f32 %v299_v53, %v282_v49  ;;  %v304_v21 = vmul.f32 %v300_v54, %v282_v49 }
  0x75   : > { %676 = vperm.xlu1 %929, %v252_v41  }
  0x76   : > { %648 = vperm.xlu0 %928, %v264_v42   ;;  %726 = vperm.xlu2 %930, %v273_v43  }
  0x78   : > { %v322_v58 = vpop.permute.xlu2 %321 }
  0x80   : > { %v317_v11 = vpop.permute.xlu2 %316 }
  0x81   : > { %v331_v27 = vadd.f32 %v317_v11, %v303_v20  ;;  %v332_v28 = vadd.f32 %v317_v11, %v304_v21 }
  0x87   : > { %v327_v52 = vpop.permute.xlu1 %326 }
  0x88   : > { %v292_v55 = vpop.permute.xlu0 %291  ;;  %v340_v29 = vpop.permute.xlu2 %339 }
  0x89   : > { %v307_v59 = vmul.f32 %v299_v53, %v292_v55  ;;  %v308_v60 = vmul.f32 %v300_v54, %v292_v55  ;;  %v363_v33 = vmul.f32 %v361_v61, %v340_v29  ;;  %v364_v34 = vmul.f32 %v362_v62, %v340_v29 }
  0x8b   : > { %v335_v3 = vadd.f32 %v327_v52, %v307_v59  ;;  %v336_v4 = vadd.f32 %v327_v52, %v308_v60 }
  0x8f   : > { %v355_v63 = vpop.permute.xlu1 %354 }
  0x90   : > { %v369_v0 = vmul.f32 %v361_v61, %v355_v63  ;;  %v370_v1 = vmul.f32 %v362_v62, %v355_v63  ;;  %v287_v2 = vpop.permute.xlu0 %286  ;;  %v457_v50 = vpop.permute.xlu2 %456 }
  0x91   : > { %v305_v9 = vmul.f32 %v299_v53, %v287_v2  ;;  %v306_v10 = vmul.f32 %v300_v54, %v287_v2 }
  0x92   : > { %v377_v5 = vadd.f32 %v369_v0, %v335_v3  ;;  %v378_v6 = vadd.f32 %v370_v1, %v336_v4 }
  0x93   : > { %v333_v14 = vadd.f32 %v322_v58, %v305_v9  ;;  %v334_v15 = vadd.f32 %v322_v58, %v306_v10 }
  0x94   : > { %v385_v7 = vmax.f32 %v377_v5, 0.0  ;;  %v386_v8 = vmax.f32 %v378_v6, 0.0 }
  0x96   : > { %408 = vmatpush.msra.mxu0 %v385_v7  ;;  %428 = vmatpush.msra.mxu1 %v386_v8 }
  0x97   : > { %v277_v12 = vpop.permute.xlu1 %276 }
  0x98   : > { %v350_v13 = vpop.permute.xlu0 %349  ;;  %v301_v24 = vmul.f32 %v299_v53, %v277_v12  ;;  %v302_v25 = vmul.f32 %v300_v54, %v277_v12  ;;  %v452_v53 = vpop.permute.xlu2 %451 }
  0x99   : > { %v367_v16 = vmul.f32 %v361_v61, %v350_v13  ;;  %v368_v17 = vmul.f32 %v362_v62, %v350_v13 }
  0x9b   : > { %v375_v18 = vadd.f32 %v367_v16, %v333_v14  ;;  %v376_v19 = vadd.f32 %v368_v17, %v334_v15 }
  0x9d   : > { %v383_v22 = vmax.f32 %v375_v18, 0.0  ;;  %v384_v23 = vmax.f32 %v376_v19, 0.0 }
  0x9f   : > { %409 = vmatpush.msra.mxu0 %v383_v22  ;;  %429 = vmatpush.msra.mxu1 %v384_v23  ;;  %v312_v26 = vpop.permute.xlu1 %311 }
  0xa0   : > { %v345_v30 = vpop.permute.xlu0 %344  ;;  %v329_v31 = vadd.f32 %v312_v26, %v301_v24  ;;  %v330_v32 = vadd.f32 %v312_v26, %v302_v25  ;;  %v447_v0 = vpop.permute.xlu2 %446 }
  0xa1   : > { %v365_v35 = vmul.f32 %v361_v61, %v345_v30  ;;  %v366_v36 = vmul.f32 %v362_v62, %v345_v30 }
  0xa2   : > { %v371_v39 = vadd.f32 %v363_v33, %v329_v31  ;;  %v372_v40 = vadd.f32 %v364_v34, %v330_v32 }
  0xa3   : > { %v373_v37 = vadd.f32 %v365_v35, %v331_v27  ;;  %v374_v38 = vadd.f32 %v366_v36, %v332_v28 }
  0xa4   : > { %v379_v43 = vmax.f32 %v371_v39, 0.0  ;;  %v380_v44 = vmax.f32 %v372_v40, 0.0 }
  0xa5   : > { %v381_v41 = vmax.f32 %v373_v37, 0.0  ;;  %v382_v42 = vmax.f32 %v374_v38, 0.0 }
  0xa7   : > { %410 = vmatpush.msra.mxu0 %v381_v41  ;;  %430 = vmatpush.msra.mxu1 %v382_v42  ;;  %v462_v47 = vpop.permute.xlu1 %461 }
  0xa8   : > { %v390_v46 = vpop.permute.xlu0 %389  ;;  %v482_v31 = vpop.permute.xlu2 %481 }
  0xa9   : > { %411 = vmatpush.msra.mxu0 %v379_v43  ;;  %431 = vmatpush.msra.mxu1 %v380_v44 }
  0xaa   : > { %873 = vmatmul.msk.f32.vlgmr.msra.gmra.mxu0 %vm392_vm1, %v268_v45  ;;  %874 = vmatmul.msk.f32.vlgmr.msra.gmra.mxu1 %vm392_vm1, %v268_v45 }
  0xaf   : > { %v525_v51 = vpop.permute.xlu1 %524 }
  0xb0   : > { %v497_v49 = vpop.permute.xlu0 %496 }
  0xb7   : > { %v520_v59 = vpop.permute.xlu1 %519 }
  0xb8   : > { %v492_v52 = vpop.permute.xlu0 %491 }
  0xbf   : > { %v515_v13 = vpop.permute.xlu1 %514 }
  0xc0   : > { %v487_v62 = vpop.permute.xlu0 %486 }
  0xc8   : > { %v510_v26 = vpop.permute.xlu0 %509 }
 0x127   : > { %v413_v54 = vpop.f32.mrf.mxu0  ;;  %v433_v55 = vpop.f32.mrf.mxu1 }
 0x128   : > { %v434_v56 = vadd.f32 %v433_v55, %v390_v46  ;;  %v414_v57 = vadd.f32 %v413_v54, %v390_v46  ;;  %v560_v54 = vpop.permute.xlu1 %559  ;;  %v629_v55 = vpop.permute.xlu2 %628 }
 0x12a   : > { %v438_v58 = vrot.slane %v434_v56, 4 }
 0x12c   : > { %v440_v60 = vsel %vm439_vm2, %v414_v57, %v438_v58  ;;  %v624_v57 = vpop.permute.xlu0 %623 }
 0x12d   : > { %v441_v61 = vrot.slane %v440_v60, 6 }
 0x12f   : > { %v1212_v63 = vadd.f32 %v441_v61, %v1199_v48 }
 0x130   : > { %v664_v56 = vpop.permute.xlu1 %663  ;;  %v692_v58 = vpop.permute.xlu2 %691 }
 0x131   : > { %v465_v1 = vperm.slane %v1212_v63, 2  ;;  %v527_v2 = vperm.slane %v1212_v63, 3  ;;  %v466_v3 = vperm.slane %v1212_v63, 6  ;;  %v528_v4 = vperm.slane %v1212_v63, 7 }
 0x133   : > { %v469_v5 = vperm.slane %v465_v1, 2  ;;  %v531_v6 = vperm.slane %v527_v2, 3  ;;  %v470_v7 = vperm.slane %v466_v3, 2  ;;  %v532_v8 = vperm.slane %v528_v4, 3 }
 0x134   : > { %v619_v60 = vpop.permute.xlu0 %618 }
 0x135   : > { %v477_v9 = vmul.f32 %v469_v5, %v462_v47  ;;  %v539_v10 = vmul.f32 %v531_v6, %v525_v51  ;;  %v478_v11 = vmul.f32 %v470_v7, %v462_v47  ;;  %v540_v12 = vmul.f32 %v532_v8, %v525_v51 }
 0x136   : > { %v475_v14 = vmul.f32 %v469_v5, %v457_v50  ;;  %v537_v15 = vmul.f32 %v531_v6, %v520_v59  ;;  %v476_v16 = vmul.f32 %v470_v7, %v457_v50  ;;  %v538_v17 = vmul.f32 %v532_v8, %v520_v59 }
 0x137   : > { %v505_v18 = vadd.f32 %v497_v49, %v477_v9  ;;  %v506_v19 = vadd.f32 %v497_v49, %v478_v11  ;;  %v473_v20 = vmul.f32 %v469_v5, %v452_v53  ;;  %v535_v21 = vmul.f32 %v531_v6, %v515_v13 }
 0x138   : > { %v503_v22 = vadd.f32 %v492_v52, %v475_v14  ;;  %v504_v23 = vadd.f32 %v492_v52, %v476_v16  ;;  %v474_v24 = vmul.f32 %v470_v7, %v452_v53  ;;  %v536_v25 = vmul.f32 %v532_v8, %v515_v13  ;;  %v269_v52 = vld [vmem:[%s1276_s3 + $0x2] sm:$0x3]  ;;  %v659_v59 = vpop.permute.xlu1 %658  ;;  %v687_v1 = vpop.permute.xlu2 %686 }
 0x139   : > { %v547_v27 = vadd.f32 %v539_v10, %v505_v18  ;;  %v548_v28 = vadd.f32 %v540_v12, %v506_v19  ;;  %v501_v29 = vadd.f32 %v487_v62, %v473_v20  ;;  %v471_v30 = vmul.f32 %v469_v5, %v447_v0 }
 0x13a   : > { %v545_v32 = vadd.f32 %v537_v15, %v503_v22  ;;  %v546_v33 = vadd.f32 %v538_v17, %v504_v23  ;;  %v502_v34 = vadd.f32 %v487_v62, %v474_v24  ;;  %v533_v35 = vmul.f32 %v531_v6, %v510_v26 }
 0x13b   : > { %v555_v36 = vmax.f32 %v547_v27, 0.0  ;;  %v556_v37 = vmax.f32 %v548_v28, 0.0  ;;  %v543_v38 = vadd.f32 %v535_v21, %v501_v29  ;;  %v499_v39 = vadd.f32 %v482_v31, %v471_v30 }
 0x13c   : > { %v544_v40 = vadd.f32 %v536_v25, %v502_v34  ;;  %v472_v41 = vmul.f32 %v470_v7, %v447_v0  ;;  %v553_v42 = vmax.f32 %v545_v32, 0.0  ;;  %v554_v43 = vmax.f32 %v546_v33, 0.0  ;;  %v614_v7 = vpop.permute.xlu0 %613 }
 0x13d   : > { %577 = vmatpush.msra.mxu2 %v555_v36  ;;  %597 = vmatpush.msra.mxu3 %v556_v37  ;;  %v541_v44 = vadd.f32 %v533_v35, %v499_v39  ;;  %v534_v46 = vmul.f32 %v532_v8, %v510_v26  ;;  %v551_v47 = vmax.f32 %v543_v38, 0.0 }
 0x13e   : > { %v500_v45 = vadd.f32 %v482_v31, %v472_v41  ;;  %v552_v49 = vmax.f32 %v544_v40, 0.0 }
 0x13f   : > { %578 = vmatpush.msra.mxu2 %v553_v42  ;;  %598 = vmatpush.msra.mxu3 %v554_v43  ;;  %v549_v51 = vmax.f32 %v541_v44, 0.0 }
 0x140   : > { %v542_v50 = vadd.f32 %v534_v46, %v500_v45  ;;  %v654_v5 = vpop.permute.xlu1 %653  ;;  %v682_v22 = vpop.permute.xlu2 %681 }
 0x141   : > { %579 = vmatpush.msra.mxu2 %v551_v47  ;;  %599 = vmatpush.msra.mxu3 %v552_v49 }
 0x142   : > { %v550_v53 = vmax.f32 %v542_v50, 0.0 }
 0x143   : > { %580 = vmatpush.msra.mxu2 %v549_v51 }
 0x144   : > { %600 = vmatpush.msra.mxu3 %v550_v53  ;;  %875 = vmatmul.msk.f32.vlgmr.msra.gmra.mxu2 %vm392_vm1, %v269_v52  ;;  %v649_v39 = vpop.permute.xlu0 %648 }
 0x145   : > { %876 = vmatmul.msk.f32.vlgmr.msra.gmra.mxu3 %vm392_vm1, %v269_v52 }
 0x148   : > { %v677_v34 = vpop.permute.xlu1 %676 }
 0x1c7   : > { %v582_v61 = vpop.f32.mrf.mxu2 }
 0x1c8   : > { %v602_v62 = vpop.f32.mrf.mxu3  ;;  %v583_v2 = vadd.f32 %v582_v61, %v560_v54 }
 0x1c9   : > { %v603_v0 = vadd.f32 %v602_v62, %v560_v54  ;;  %v727_v62 = vpop.permute.xlu2 %726 }
 0x1cb   : > { %v607_v3 = vrot.slane %v603_v0, 4 }
 0x1cd   : > { %v608_v4 = vsel %vm439_vm2, %v583_v2, %v607_v3 }
 0x1ce   : > { %v610_v6 = vadd.f32 %v608_v4, %v1199_v48 }
 0x1d0   : > { %v632_v8 = vperm.slane %v610_v6, 0  ;;  %v694_v9 = vperm.slane %v610_v6, 1  ;;  %v633_v10 = vperm.slane %v610_v6, 4  ;;  %v695_v11 = vperm.slane %v610_v6, 5 }
 0x1d1   : > { %v785_v12 = vmul.f32 10.0, %v610_v6 }
 0x1d2   : > { %v636_v13 = vperm.slane %v632_v8, 0  ;;  %v698_v14 = vperm.slane %v694_v9, 1  ;;  %v637_v15 = vperm.slane %v633_v10, 0  ;;  %v699_v16 = vperm.slane %v695_v11, 1 }
 0x1d3   : > { %v787_v17 = vrot.slane %v785_v12, 6 }
 0x1d4   : > { %v644_v18 = vmul.f32 %v636_v13, %v629_v55  ;;  %v706_v19 = vmul.f32 %v698_v14, %v692_v58  ;;  %v645_v20 = vmul.f32 %v637_v15, %v629_v55  ;;  %v707_v21 = vmul.f32 %v699_v16, %v692_v58 }
 0x1d5   : > { %v642_v23 = vmul.f32 %v636_v13, %v624_v57  ;;  %v704_v48 = vmul.f32 %v698_v14, %v687_v1  ;;  %v643_v24 = vmul.f32 %v637_v15, %v624_v57  ;;  %v705_v25 = vmul.f32 %v699_v16, %v687_v1  ;;  %789 = vst [vmem:[%s1228_s14] sm:$0xcc] %v787_v17 }
 0x1d6   : > { %v672_v26 = vadd.f32 %v664_v56, %v644_v18  ;;  %v673_v27 = vadd.f32 %v664_v56, %v645_v20  ;;  %v640_v28 = vmul.f32 %v636_v13, %v619_v60  ;;  %v702_v29 = vmul.f32 %v698_v14, %v682_v22 }
 0x1d7   : > { %v670_v30 = vadd.f32 %v659_v59, %v642_v23  ;;  %v671_v31 = vadd.f32 %v659_v59, %v643_v24  ;;  %v641_v32 = vmul.f32 %v637_v15, %v619_v60  ;;  %v703_v33 = vmul.f32 %v699_v16, %v682_v22  ;;  %v270_v60 = vld [vmem:[%s1276_s3 + $0x4] sm:$0x3] }
 0x1d8   : > { %v714_v35 = vadd.f32 %v706_v19, %v672_v26  ;;  %v715_v36 = vadd.f32 %v707_v21, %v673_v27  ;;  %v668_v37 = vadd.f32 %v654_v5, %v640_v28  ;;  %v638_v38 = vmul.f32 %v636_v13, %v614_v7 }
 0x1d9   : > { %v712_v40 = vadd.f32 %v704_v48, %v670_v30  ;;  %v713_v41 = vadd.f32 %v705_v25, %v671_v31  ;;  %v669_v42 = vadd.f32 %v654_v5, %v641_v32  ;;  %v700_v43 = vmul.f32 %v698_v14, %v677_v34 }
 0x1da   : > { %v722_v44 = vmax.f32 %v714_v35, 0.0  ;;  %v723_v45 = vmax.f32 %v715_v36, 0.0  ;;  %v710_v46 = vadd.f32 %v702_v29, %v668_v37  ;;  %v666_v47 = vadd.f32 %v649_v39, %v638_v38 }
 0x1db   : > { %v711_v49 = vadd.f32 %v703_v33, %v669_v42  ;;  %v639_v50 = vmul.f32 %v637_v15, %v614_v7  ;;  %v720_v51 = vmax.f32 %v712_v40, 0.0  ;;  %v721_v52 = vmax.f32 %v713_v41, 0.0 }
 0x1dc   : > { %744 = vmatpush.msrb.mxu0 %v722_v44  ;;  %764 = vmatpush.msrb.mxu1 %v723_v45  ;;  %v708_v53 = vadd.f32 %v700_v43, %v666_v47  ;;  %v701_v55 = vmul.f32 %v699_v16, %v677_v34  ;;  %v718_v56 = vmax.f32 %v710_v46, 0.0 }
 0x1dd   : > { %v667_v54 = vadd.f32 %v649_v39, %v639_v50  ;;  %v719_v57 = vmax.f32 %v711_v49, 0.0 }
 0x1de   : > { %745 = vmatpush.msrb.mxu0 %v720_v51  ;;  %765 = vmatpush.msrb.mxu1 %v721_v52  ;;  %v716_v59 = vmax.f32 %v708_v53, 0.0 }
 0x1df   : > { %v709_v58 = vadd.f32 %v701_v55, %v667_v54 }
 0x1e0   : > { %746 = vmatpush.msrb.mxu0 %v718_v56  ;;  %766 = vmatpush.msrb.mxu1 %v719_v57 }
 0x1e1   : > { %v717_v61 = vmax.f32 %v709_v58, 0.0 }
 0x1e2   : > { %747 = vmatpush.msrb.mxu0 %v716_v59 }
 0x1e3   : > { %767 = vmatpush.msrb.mxu1 %v717_v61  ;;  %877 = vmatmul.msk.f32.vlgmr.msrb.gmra.mxu0 %vm392_vm1, %v270_v60 }
 0x1e4   : > { %878 = vmatmul.msk.f32.vlgmr.msrb.gmra.mxu1 %vm392_vm1, %v270_v60 }
 0x260   : > { %v749_v0 = vpop.f32.mrf.mxu0 }
 0x261   : > { %v769_v1 = vpop.f32.mrf.mxu1  ;;  %v750_v3 = vadd.f32 %v749_v0, %v727_v62 }
 0x262   : > { %v770_v2 = vadd.f32 %v769_v1, %v727_v62 }
 0x264   : > { %v774_v4 = vrot.slane %v770_v2, 4 }
 0x266   : > { %v775_v5 = vsel %vm439_vm2, %v750_v3, %v774_v4 }
 0x267   : > { %v776_v6 = vrot.slane %v775_v5, 6 }
 0x269   : > { %v778_v7 = vadd.f32 %v776_v6, %v1212_v63 }
 0x26b   : > { %v779_v8 = vmul.f32 10.0, %v778_v7 }
 0x26d   : > { %v879_v9 = vrot.slane %v779_v8, 10 }
 0x26f   : > { %784 = vst [vmem:[%s1228_s14] sm:$0x33] %v879_v9 }
 0x270   : > { %960 = shalt.err (!%p957_p3)
}
 0x271   : > { %887 = dma.vmem_to_hbm [thread:$0]  (%p1067_p5), %s805_s30, 128, %s807_s6, %s791_s7  }
 0x272 PF: > { %p893_p4 = scmp.ge.s32.totalorder %s995_s21, 2  ;;  %s818_s12 = sand.u32 1, %s983_s18  }
 0x273   : > { %s819_s14 = scalar_lea.sflag [#allocation3], %s818_s12 }
 0x274   : > { %p890_p7 = pnand %p893_p4, %p1071_p6 }
 0x276   : > { %p891_p8 = pneg %p890_p7 }
 0x278   : > { %978 = dma.done.wait (%p891_p8), %s819_s14, 128  }
 0x279   : > { %980 = vsyncadd (%p891_p8), %s819_s14, 4294967168  ;;  %p15_p9 = scmp.ge.s32.totalorder %s1054_s24, 4   ;;  %s1281_s18 = smov %s987_s19 }
 0x27a   : > { %s1282_s19 = smov %s991_s20  ;;  %s1283_s20 = smov %s1065_s27 }
 0x27b   : > { %s1284_s21 = smov %s1054_s24  ;;  %17 = sbr.rel (!%p15_p9) target bundleno = 3 (0x3), region = 75 }
 0x280   :  { %825 = vsyncpa [#allocation3], 1 }
 0x281   :  { %827 = vsyncpa [#allocation3 + $0x1], 1 }

</bundles_post_ra>
